<compile_context>
chip_gen: v7x
topology: tpu7x:2x2x1
jax: 0.10.0
libtpu: 0.0.40
codegen_flags: <defaults>
</compile_context>

<pallas_src>
import jax
import jax.numpy as jnp
from jax.experimental import pallas as pl
from jax.experimental.pallas import tpu as pltpu

_LANE = 128


def _query_vmem_budget():
    """(explicit vmem_limit_bytes, per-buffer block bytes).

    The auto pipeline double-buffers both the input and the output block, so
    4 copies of a block live in VMEM at once; leave ~25% headroom on top.
    """
    try:
        phys = int(pltpu.get_tpu_info().vmem_capacity_bytes)
    except Exception:  # not queryable: assume v5e/v6e-class (128 MiB physical)
        phys = 128 * 1024 * 1024
    vmem_limit = min(32 * 1024 * 1024, phys // 2)   # 32 MiB on v5e/v6e/v7x
    block_bytes = (vmem_limit // 4) * 3 // 4        # ~6 MiB per buffer
    return vmem_limit, block_bytes


_VMEM_LIMIT_BYTES, _BLOCK_BYTES = _query_vmem_budget()


def _hswish_kernel(x_ref, o_ref):
    x = x_ref[...]
    # hswish(x) = x * relu6(x + 3) / 6  (do NOT micro-optimize: memory-bound)
    relu6 = jnp.clip(x + 3.0, 0.0, 6.0)
    o_ref[...] = (x * relu6 * (1.0 / 6.0)).astype(o_ref.dtype)


def _round_up(a, b):
    return pl.cdiv(a, b) * b


def _pick_tile_rows(rows, itemsize):
    # sublane packing: 8 rows for 32-bit, 16 for bf16, 32 for int8/fp8
    sublane = max(8, 32 // max(int(itemsize), 1))
    target = _BLOCK_BYTES // (_LANE * int(itemsize))
    tile_rows = max(sublane, (target // sublane) * sublane)
    # Don't make the block (much) larger than the array itself.
    tile_rows = min(tile_rows, _round_up(rows, sublane))
    return tile_rows


def _hswish_2d(x2d):
    rows, lane = x2d.shape
    tile_rows = _pick_tile_rows(rows, jnp.dtype(x2d.dtype).itemsize)
    grid = (pl.cdiv(rows, tile_rows),)
    return pl.pallas_call(
        _hswish_kernel,
        out_shape=jax.ShapeDtypeStruct((rows, lane), x2d.dtype),
        grid_spec=pltpu.PrefetchScalarGridSpec(
            num_scalar_prefetch=0,
            grid=grid,
            in_specs=[pl.BlockSpec((tile_rows, lane), lambda i: (i, 0))],
            out_specs=pl.BlockSpec((tile_rows, lane), lambda i: (i, 0)),
        ),
        compiler_params=pltpu.CompilerParams(
            # "parallel" lets v7x shard the block stream across both TCs;
            # no-op on v5e/v6e.  TODO(synk): verify dual-TC sharding in xprof
            # on v7x; switch to pltpu.CORE_PARALLEL if only one TC is used.
            dimension_semantics=("parallel",),
            vmem_limit_bytes=_VMEM_LIMIT_BYTES,
        ),
    )(x2d)


def _hswish_jnp(x):
    return x * jnp.clip(x + 3.0, 0.0, 6.0) * (1.0 / 6.0)


@jax.jit
def hswish(x):
    """Elementwise hard-swish. Accepts any shape (layout-agnostic)."""
    if not jnp.issubdtype(x.dtype, jnp.floating):
        raise TypeError(f"hswish expects a floating dtype, got {x.dtype}")
    orig_shape = x.shape
    n = x.size

    if n % _LANE == 0:
        # Main (copy-free) path: reshape to a lane-dense (rows, 128) slab is
        # metadata-only; ragged last row-block is handled by the grid.
        rows = n // _LANE
        out2d = _hswish_2d(x.reshape(rows, _LANE))
        return out2d.reshape(orig_shape)

    # Rare ragged path: run the kernel on the leading floor(n/128)*128
    # elements (still lane-dense, no padded full-array copy) and compute the
    # <128-element tail with plain jnp, then stitch.
    n_main = (n // _LANE) * _LANE
    x_flat = x.reshape(-1)
    if n_main == 0:
        return _hswish_jnp(x)
    out_main = _hswish_2d(x_flat[:n_main].reshape(n_main // _LANE, _LANE))
    out_tail = _hswish_jnp(x_flat[n_main:])
    return jnp.concatenate([out_main.reshape(-1), out_tail]).reshape(orig_shape)


def hswish_ref(x):
    return x * jnp.clip(x + 3.0, 0.0, 6.0) / 6.0


if __name__ == "__main__":
    key = jax.random.PRNGKey(0)
    # NCHW like PyTorch: batch=2, channels=4, spatial=16x16
    x = jax.random.normal(key, (2, 4, 16, 16), dtype=jnp.float32) * 4.0

    out = jax.block_until_ready(hswish(x))
    ref = hswish_ref(x)
    assert out.shape == x.shape and out.dtype == x.dtype
    assert jnp.allclose(out, ref, atol=1e-5, rtol=1e-5), "mismatch vs reference"

    # Exercise the ragged-size path (flat size 462, not a multiple of 128).
    x2 = jax.random.normal(jax.random.PRNGKey(1), (2, 3, 11, 7),
                           dtype=jnp.float32) * 4.0
    out2 = jax.block_until_ready(hswish(x2))
    assert out2.shape == x2.shape and out2.dtype == x2.dtype
    assert jnp.allclose(out2, hswish_ref(x2), atol=1e-5, rtol=1e-5), \
        "mismatch vs reference (ragged path)"

    print("KERNEL_OK")
</pallas_src>

<mosaic_0001>
module attributes {stable_mosaic.version = 11 : i64} {
  func.func @_hswish_kernel(%arg0: i32, %arg1: memref<16x128xf32, #tpu.memory_space<vmem>>, %arg2: memref<16x128xf32, #tpu.memory_space<vmem>>) attributes {dimension_semantics = [#tpu.dimension_semantics<parallel>], iteration_bounds = array<i64: 1>, scalar_prefetch = 0 : i64, scratch_operands = 0 : i64, tpu.core_type = #tpu.core_type<tc>, window_params = [{transform_indices = @transform_0, window_bounds = array<i64: 16, 128>}, {transform_indices = @transform_1, window_bounds = array<i64: 16, 128>}]} {
    %c0 = arith.constant 0 : index
    %c0_0 = arith.constant 0 : index
    %0 = vector.load %arg1[%c0, %c0_0] : memref<16x128xf32, #tpu.memory_space<vmem>>, vector<16x128xf32>
    %cst = arith.constant 3.000000e+00 : f32
    %1 = vector.broadcast %cst : f32 to vector<16x128xf32>
    %2 = arith.addf %0, %1 : vector<16x128xf32>
    %cst_1 = arith.constant 0.000000e+00 : f32
    %cst_2 = arith.constant 6.000000e+00 : f32
    %3 = vector.broadcast %cst_1 : f32 to vector<16x128xf32>
    %4 = arith.maximumf %3, %2 : vector<16x128xf32>
    %5 = vector.broadcast %cst_2 : f32 to vector<16x128xf32>
    %6 = arith.minimumf %5, %4 : vector<16x128xf32>
    %7 = arith.mulf %0, %6 : vector<16x128xf32>
    %cst_3 = arith.constant 0.166666672 : f32
    %8 = vector.broadcast %cst_3 : f32 to vector<16x128xf32>
    %9 = arith.mulf %7, %8 : vector<16x128xf32>
    %c0_4 = arith.constant 0 : index
    %c0_5 = arith.constant 0 : index
    %10 = vector.load %arg2[%c0_4, %c0_5] : memref<16x128xf32, #tpu.memory_space<vmem>>, vector<16x128xf32>
    tpu.vector_store %arg2[%c0_4, %c0_5], %9 {strides = array<i32>} : memref<16x128xf32, #tpu.memory_space<vmem>>, vector<16x128xf32>,
    return
  }
  func.func @transform_0(%arg0: i32) -> (i32, i32) {
    %c0_i32 = arith.constant 0 : i32
    %c0_i32_0 = arith.constant 0 : i32
    return %arg0, %c0_i32 : i32, i32
  }
  func.func @transform_1(%arg0: i32) -> (i32, i32) {
    %c0_i32 = arith.constant 0 : i32
    %c0_i32_0 = arith.constant 0 : i32
    return %arg0, %c0_i32 : i32, i32
  }
}

</mosaic_0001>

<bundles_post_ra>
// kernel: hswish.1
= control target key start
LH: loop header
LB: loop body
LE: loop exit
PB: predicated region body
PF: predicated region fallthrough
CT: control target
= control target key end

     0   :  { %s48_s0 = inlined_call_operand.vmem [shape: f32[16,128], index: 0, kind: input, shape index: {}]   ;;  %s49_s1 = inlined_call_operand.vmem [shape: f32[16,128], index: 1, kind: output, shape index: {}]  }
   0x1   :  { %v8_v0 = vld [vmem:[%s48_s0] sm:$0xff]  ;;  %v9_v1 = vld [vmem:[%s48_s0 + $0x8] sm:$0xff] }
   0x2   :  { %v10_v2 = vadd.f32 3.0, %v8_v0  ;;  %v11_v3 = vadd.f32 3.0, %v9_v1 }
   0x4   :  { %v12_v4 = vmax.f32 %v10_v2, 0.0  ;;  %v13_v5 = vmax.f32 %v11_v3, 0.0 }
   0x6   :  { %v14_v6 = vmin.f32 %v12_v4, 6.0  ;;  %v15_v7 = vmin.f32 %v13_v5, 6.0 }
   0x8   :  { %v16_v8 = vmul.f32 %v14_v6, %v8_v0  ;;  %v17_v9 = vmul.f32 %v15_v7, %v9_v1 }
   0xa   :  { %v18_v10 = vmul.f32 0.16666667, %v16_v8  ;;  %v19_v11 = vmul.f32 0.16666667, %v17_v9 }
   0xc   :  { %20 = vst [vmem:[%s49_s1] sm:$0xff] %v18_v10  ;;  %21 = vst [vmem:[%s49_s1 + $0x8] sm:$0xff] %v19_v11 }

</bundles_post_ra>
